<compile_context>
chip_gen: v6e
topology: v6e:2x2x1
jax: 0.10.0
libtpu: 0.0.40
codegen_flags: <defaults>
</compile_context>

<pallas_src>
import functools

import jax
import jax.numpy as jnp
from jax.experimental import pallas as pl
from jax.experimental.pallas import tpu as pltpu

LANE = 128
TILE_TARGET = 512            # pad N to a multiple of this so big tiles always divide evenly
X_RESIDENT_BUDGET = 8 * 1024 * 1024  # keep X fully VMEM-resident if it fits in this many bytes


def _round_up(x, m):
    return (x + m - 1) // m * m


def _pick_tile(n, prefs, min_blocks=1):
    """Largest preferred tile dividing n that leaves at least min_blocks grid steps."""
    for t in prefs:
        if n % t == 0 and n // t >= min_blocks:
            return t
    for t in prefs:
        if n % t == 0:
            return t
    return n


def _vmem_limit_bytes():
    """Per-generation scoped-VMEM budget (v5e/v6e: 128 MiB physical, v7x: 64 MiB per TC)."""
    try:
        cap = pltpu.get_tpu_info().vmem_capacity_bytes
    except Exception:
        cap = 64 * 1024 * 1024  # conservative default
    if cap >= 128 * 1024 * 1024:
        return 100 * 1024 * 1024
    return 48 * 1024 * 1024


# ---------------------------------------------------------------------------
# Pallas kernel: one GCN layer, tiled over (dst-row tiles, src/K tiles).
#   acc[i, :] += A[i, k] @ X[k, :]                 (bf16 MXU, f32 accumulation)
#   on last k:  O[i, :] = act(acc.bf16 @ W + b)    (bf16xbf16->f32 transform, once per row tile)
# ---------------------------------------------------------------------------
def _gcn_layer_kernel(a_ref, x_ref, w_ref, b_ref, o_ref, acc_ref, *,
                      apply_relu, x_resident, tk):
    k = pl.program_id(1)

    @pl.when(k == 0)
    def _():
        acc_ref[...] = jnp.zeros_like(acc_ref)

    if x_resident:
        # X lives fully in VMEM (constant index_map) -> slice out this K chunk, no re-stream.
        start = pl.multiple_of(k * tk, tk)
        x_tile = x_ref[pl.ds(start, tk), :]
    else:
        x_tile = x_ref[...]

    # Neighborhood aggregation on the dominant N^2 operand (bf16 in, f32 acc).
    acc_ref[...] += jnp.dot(a_ref[...], x_tile, preferred_element_type=jnp.float32)

    @pl.when(k == pl.num_programs(1) - 1)
    def _():
        # (A @ X) @ W == A @ (X @ W); small dense transform once per row tile.
        # bf16 x bf16 -> f32 keeps this on the fast MXU path.
        h = jnp.dot(acc_ref[...].astype(w_ref.dtype), w_ref[...],
                    preferred_element_type=jnp.float32)
        h = h + b_ref[...]
        if apply_relu:
            h = jnp.maximum(h, 0.0)
        o_ref[...] = h.astype(o_ref.dtype)


def gcn_layer(a_hat, x, w, b, *, apply_relu, out_dtype):
    """One GCN layer on padded, lane-dense operands.

    a_hat: (Np, Np) bf16   x: (Np, Cin_p) bf16   w: (Cin_p, Cout_p) bf16   b: (1, Cout_p) f32
    """
    n_pad = a_hat.shape[0]
    c_in = x.shape[1]
    c_out = w.shape[1]

    # Big tiles (HBM-bound stream wants >=512); keep >=2 row blocks for megacore sharding.
    tm = _pick_tile(n_pad, (1024, 512, 256, 128), min_blocks=2)
    tk = _pick_tile(n_pad, (2048, 1024, 512, 256, 128))
    grid = (n_pad // tm, n_pad // tk)

    # Hold X fully VMEM-resident when small enough -> fetched once instead of once per row tile.
    x_bytes = x.size * x.dtype.itemsize
    x_resident = x_bytes <= X_RESIDENT_BUDGET

    if x_resident:
        x_spec = pl.BlockSpec((n_pad, c_in), lambda i, k: (0, 0))
        x_traffic = x_bytes
    else:
        x_spec = pl.BlockSpec((tk, c_in), lambda i, k: (k, 0))
        x_traffic = x_bytes * grid[0]

    flops = 2 * n_pad * n_pad * c_in + 2 * n_pad * c_in * c_out
    bytes_accessed = (
        a_hat.size * a_hat.dtype.itemsize
        + x_traffic
        + w.size * w.dtype.itemsize
        + b.size * b.dtype.itemsize
        + n_pad * c_out * jnp.dtype(out_dtype).itemsize
    )

    kernel = functools.partial(
        _gcn_layer_kernel, apply_relu=apply_relu, x_resident=x_resident, tk=tk
    )
    return pl.pallas_call(
        kernel,
        out_shape=jax.ShapeDtypeStruct((n_pad, c_out), out_dtype),
        grid_spec=pltpu.PrefetchScalarGridSpec(
            num_scalar_prefetch=0,
            grid=grid,
            in_specs=[
                pl.BlockSpec((tm, tk), lambda i, k: (i, k)),       # A_hat tile (streamed)
                x_spec,                                            # node features
                pl.BlockSpec((c_in, c_out), lambda i, k: (0, 0)),  # W (bf16, VMEM-resident)
                pl.BlockSpec((1, c_out), lambda i, k: (0, 0)),     # bias (f32)
            ],
            out_specs=pl.BlockSpec((tm, c_out), lambda i, k: (i, 0)),
            scratch_shapes=[pltpu.VMEM((tm, c_in), jnp.float32)],
        ),
        compiler_params=pltpu.CompilerParams(
            dimension_semantics=("parallel", "arbitrary"),  # row tiles shard across v7x's 2 TCs
            vmem_limit_bytes=_vmem_limit_bytes(),
        ),
        cost_estimate=pl.CostEstimate(
            flops=flops, transcendentals=0, bytes_accessed=bytes_accessed
        ),
    )(a_hat, x, w, b)


def gcn_forward(a_hat_bf16, x_bf16, w1_bf16, b1, w2_bf16, b2):
    # Layer 1: H = relu(A_hat @ X @ W1 + b1); kept in bf16 for layer 2's streaming.
    h = gcn_layer(a_hat_bf16, x_bf16, w1_bf16, b1, apply_relu=True, out_dtype=jnp.bfloat16)
    # Layer 2: OUT = A_hat @ H @ W2 + b2 (f32 output).
    return gcn_layer(a_hat_bf16, h, w2_bf16, b2, apply_relu=False, out_dtype=jnp.float32)


# ---------------------------------------------------------------------------
# Glue (plain JAX): build normalized dense adjacency from edge_index (gcn_norm).
# ---------------------------------------------------------------------------
def build_normalized_adj(edge_index, num_nodes):
    src = edge_index[0]
    dst = edge_index[1]
    # Drop explicit self-loops, then add unit self-loops for every node
    # (matches gcn_norm / add_remaining_self_loops with fill_value=1).
    w = jnp.where(src == dst, 0.0, 1.0)
    adj = jnp.zeros((num_nodes, num_nodes), jnp.float32).at[dst, src].add(w)
    adj = adj + jnp.eye(num_nodes, dtype=jnp.float32)
    deg = adj.sum(axis=1)
    dinv = jnp.where(deg > 0, jax.lax.rsqrt(deg), 0.0)
    return dinv[:, None] * adj * dinv[None, :]


# Deterministic parameter init (GCNConv: glorot weight, zero bias).
def init_params(key, in_channels, hidden_channels, out_channels):
    k1, k2 = jax.random.split(key)

    def glorot(k, fan_in, fan_out):
        limit = jnp.sqrt(6.0 / (fan_in + fan_out))
        return jax.random.uniform(
            k, (fan_in, fan_out), jnp.float32, minval=-limit, maxval=limit
        )

    w1 = glorot(k1, in_channels, hidden_channels)
    b1 = jnp.zeros((1, hidden_channels), jnp.float32)
    w2 = glorot(k2, hidden_channels, out_channels)
    b2 = jnp.zeros((1, out_channels), jnp.float32)
    return w1, b1, w2, b2


def _pad2(a, rows, cols):
    r, c = a.shape
    return jnp.pad(a, ((0, rows - r), (0, cols - c)))


# Pure-JAX reference for correctness check.
def gcn_ref(a_hat, x, w1, b1, w2, b2):
    h = jnp.maximum(a_hat @ (x @ w1) + b1, 0.0)
    return a_hat @ (h @ w2) + b2


if __name__ == "__main__":
    # Small shapes consistent with the module: N nodes, in=8, hidden=32, out=16.
    num_nodes = 300        # pads to 512 -> tm=256 (grid[0]=2 for megacore), tk=512
    in_channels = 8
    hidden_channels = 32
    out_channels = 16
    num_edges = 1200

    key = jax.random.PRNGKey(0)
    kx, ke, kp = jax.random.split(key, 3)

    x = jax.random.normal(kx, (num_nodes, in_channels), jnp.float32)
    edge_index = jax.random.randint(ke, (2, num_edges), 0, num_nodes, jnp.int32)

    w1, b1, w2, b2 = init_params(kp, in_channels, hidden_channels, out_channels)
    a_hat = build_normalized_adj(edge_index, num_nodes)

    # ---- pad to lane-dense / tile-friendly shapes; cast streaming operands + W to bf16 ----
    n_pad = _round_up(num_nodes, TILE_TARGET)
    cin_p = _round_up(in_channels, LANE)
    chid_p = _round_up(hidden_channels, LANE)
    cout_p = _round_up(out_channels, LANE)

    # NOTE: A_hat must be zero-padded (padded columns kill any garbage in padded H rows).
    a_p = _pad2(a_hat, n_pad, n_pad).astype(jnp.bfloat16)
    x_p = _pad2(x, n_pad, cin_p).astype(jnp.bfloat16)
    w1_p = _pad2(w1, cin_p, chid_p).astype(jnp.bfloat16)
    b1_p = _pad2(b1, 1, chid_p)
    w2_p = _pad2(w2, chid_p, cout_p).astype(jnp.bfloat16)
    b2_p = _pad2(b2, 1, cout_p)

    out_p = gcn_forward(a_p, x_p, w1_p, b1_p, w2_p, b2_p)
    out_p = jax.block_until_ready(out_p)
    out = out_p[:num_nodes, :out_channels]

    # Reference in f32 on the same bf16-quantized A/X/W (remaining error: in-kernel bf16 H/acc).
    a32 = a_p[:num_nodes, :num_nodes].astype(jnp.float32)
    x32 = x_p[:num_nodes, :in_channels].astype(jnp.float32)
    w1_32 = w1_p[:in_channels, :hidden_channels].astype(jnp.float32)
    w2_32 = w2_p[:hidden_channels, :out_channels].astype(jnp.float32)
    ref = gcn_ref(a32, x32, w1_32, b1, w2_32, b2)

    assert out.shape == (num_nodes, out_channels)
    max_err = float(jnp.abs(out - ref).max())
    assert jnp.allclose(out, ref, atol=7e-2, rtol=7e-2), f"max abs err = {max_err}"

    print("KERNEL_OK")
</pallas_src>

<mosaic_0001>
module attributes {stable_mosaic.version = 11 : i64} {
  func.func @_gcn_layer_kernel(%arg0: i32, %arg1: i32, %arg2: memref<256x512xbf16, #tpu.memory_space<vmem>>, %arg3: memref<512x128xbf16, #tpu.memory_space<vmem>>, %arg4: memref<128x128xbf16, #tpu.memory_space<vmem>>, %arg5: memref<1x128xf32, #tpu.memory_space<vmem>>, %arg6: memref<256x128xbf16, #tpu.memory_space<vmem>>, %arg7: memref<256x128xf32, #tpu.memory_space<vmem>>) attributes {dimension_semantics = [#tpu.dimension_semantics<parallel>, #tpu.dimension_semantics<arbitrary>], iteration_bounds = array<i64: 2, 1>, scalar_prefetch = 0 : i64, scratch_operands = 1 : i64, tpu.core_type = #tpu.core_type<tc>, window_params = [{transform_indices = @transform_0, window_bounds = array<i64: 256, 512>}, {pipeline_mode = #tpu.pipeline_mode<synchronous>, transform_indices = @transform_1, window_bounds = array<i64: 512, 128>}, {pipeline_mode = #tpu.pipeline_mode<synchronous>, transform_indices = @transform_2, window_bounds = array<i64: 128, 128>}, {pipeline_mode = #tpu.pipeline_mode<synchronous>, transform_indices = @transform_3, window_bounds = array<i64: 1, 128>}, {transform_indices = @transform_4, window_bounds = array<i64: 256, 128>}]} {
    %c0_i32 = arith.constant 0 : i32
    %0 = arith.cmpi eq, %arg1, %c0_i32 : i32
    %1 = arith.extui %0 : i1 to i32
    %c0_i32_0 = arith.constant 0 : i32
    %2 = arith.cmpi ne, %1, %c0_i32_0 : i32
    scf.if %2 {
      %cst_9 = arith.constant 0.000000e+00 : f32
      %15 = vector.broadcast %cst_9 : f32 to vector<256x128xf32>
      %c0_10 = arith.constant 0 : index
      %c0_11 = arith.constant 0 : index
      %16 = vector.load %arg7[%c0_10, %c0_11] : memref<256x128xf32, #tpu.memory_space<vmem>>, vector<256x128xf32>
      tpu.vector_store %arg7[%c0_10, %c0_11], %15 {strides = array<i32>} : memref<256x128xf32, #tpu.memory_space<vmem>>, vector<256x128xf32>,
    } else {
    }
    %c512_i32 = arith.constant 512 : i32
    %3 = arith.muli %arg1, %c512_i32 : i32
    %4 = tpu.assume_multiple %3, 512 : i32
    %5 = arith.index_cast %4 : i32 to index
    %c0 = arith.constant 0 : index
    %6 = vector.load %arg3[%5, %c0] : memref<512x128xbf16, #tpu.memory_space<vmem>>, vector<512x128xbf16>
    %c0_1 = arith.constant 0 : index
    %c0_2 = arith.constant 0 : index
    %7 = vector.load %arg7[%c0_1, %c0_2] : memref<256x128xf32, #tpu.memory_space<vmem>>, vector<256x128xf32>
    %c0_3 = arith.constant 0 : index
    %c0_4 = arith.constant 0 : index
    %8 = vector.load %arg2[%c0_3, %c0_4] : memref<256x512xbf16, #tpu.memory_space<vmem>>, vector<256x512xbf16>
    %cst = arith.constant dense<0.000000e+00> : vector<256x128xf32>
    %9 = tpu.matmul %8, %6, %cst {dimension_numbers = #tpu.dot_dimension_numbers<[1], [0], [0], [1], [0, 0, 1, 1], [], []>} : vector<256x512xbf16>, vector<512x128xbf16>, vector<256x128xf32> -> vector<256x128xf32>
    %10 = arith.addf %7, %9 : vector<256x128xf32>
    %c0_5 = arith.constant 0 : index
    %c0_6 = arith.constant 0 : index
    %11 = vector.load %arg7[%c0_5, %c0_6] : memref<256x128xf32, #tpu.memory_space<vmem>>, vector<256x128xf32>
    tpu.vector_store %arg7[%c0_5, %c0_6], %10 {strides = array<i32>} : memref<256x128xf32, #tpu.memory_space<vmem>>, vector<256x128xf32>,
    %c0_i32_7 = arith.constant 0 : i32
    %12 = arith.cmpi eq, %arg1, %c0_i32_7 : i32
    %13 = arith.extui %12 : i1 to i32
    %c0_i32_8 = arith.constant 0 : i32
    %14 = arith.cmpi ne, %13, %c0_i32_8 : i32
    scf.if %14 {
      %c0_9 = arith.constant 0 : index
      %c0_10 = arith.constant 0 : index
      %15 = vector.load %arg7[%c0_9, %c0_10] : memref<256x128xf32, #tpu.memory_space<vmem>>, vector<256x128xf32>
      %16 = arith.truncf %15 : vector<256x128xf32> to vector<256x128xbf16>
      %c0_11 = arith.constant 0 : index
      %c0_12 = arith.constant 0 : index
      %17 = vector.load %arg4[%c0_11, %c0_12] : memref<128x128xbf16, #tpu.memory_space<vmem>>, vector<128x128xbf16>
      %cst_13 = arith.constant dense<0.000000e+00> : vector<256x128xf32>
      %18 = tpu.matmul %16, %17, %cst_13 {dimension_numbers = #tpu.dot_dimension_numbers<[1], [0], [0], [1], [0, 0, 1, 1], [], []>} : vector<256x128xbf16>, vector<128x128xbf16>, vector<256x128xf32> -> vector<256x128xf32>
      %c0_14 = arith.constant 0 : index
      %c0_15 = arith.constant 0 : index
      %19 = vector.load %arg5[%c0_14, %c0_15] : memref<1x128xf32, #tpu.memory_space<vmem>>, vector<1x128xf32>
      %20 = vector.broadcast %19 : vector<1x128xf32> to vector<256x128xf32>
      %21 = arith.addf %18, %20 : vector<256x128xf32>
      %cst_16 = arith.constant 0.000000e+00 : f32
      %22 = vector.broadcast %cst_16 : f32 to vector<256x128xf32>
      %23 = arith.maximumf %21, %22 : vector<256x128xf32>
      %24 = arith.truncf %23 : vector<256x128xf32> to vector<256x128xbf16>
      %c0_17 = arith.constant 0 : index
      %c0_18 = arith.constant 0 : index
      %25 = vector.load %arg6[%c0_17, %c0_18] : memref<256x128xbf16, #tpu.memory_space<vmem>>, vector<256x128xbf16>
      tpu.vector_store %arg6[%c0_17, %c0_18], %24 {strides = array<i32>} : memref<256x128xbf16, #tpu.memory_space<vmem>>, vector<256x128xbf16>,
    } else {
    }
    return
  }
  func.func @transform_0(%arg0: i32, %arg1: i32) -> (i32, i32) {
    %c0_i32 = arith.constant 0 : i32
    return %arg0, %arg1 : i32, i32
  }
  func.func @transform_1(%arg0: i32, %arg1: i32) -> (i32, i32) {
    %c0_i32 = arith.constant 0 : i32
    %c0_i32_0 = arith.constant 0 : i32
    %c0_i32_1 = arith.constant 0 : i32
    return %c0_i32, %c0_i32_0 : i32, i32
  }
  func.func @transform_2(%arg0: i32, %arg1: i32) -> (i32, i32) {
    %c0_i32 = arith.constant 0 : i32
    %c0_i32_0 = arith.constant 0 : i32
    %c0_i32_1 = arith.constant 0 : i32
    return %c0_i32, %c0_i32_0 : i32, i32
  }
  func.func @transform_3(%arg0: i32, %arg1: i32) -> (i32, i32) {
    %c0_i32 = arith.constant 0 : i32
    %c0_i32_0 = arith.constant 0 : i32
    %c0_i32_1 = arith.constant 0 : i32
    return %c0_i32, %c0_i32_0 : i32, i32
  }
  func.func @transform_4(%arg0: i32, %arg1: i32) -> (i32, i32) {
    %c0_i32 = arith.constant 0 : i32
    %c0_i32_0 = arith.constant 0 : i32
    return %arg0, %c0_i32 : i32, i32
  }
}

</mosaic_0001>

<bundles_post_ra>
// kernel: tpu_custom_call.1
= control target key start
LH: loop header
LB: loop body
LE: loop exit
PB: predicated region body
PF: predicated region fallthrough
CT: control target
= control target key end

     0   :  { %9 = vsyncpa [#allocation4], 0  ;;  %s3319_s0 = inlined_call_operand.hbm [shape: bf16[512,512], index: 0, kind: input, shape index: {}]   ;;  %s3320_s1 = inlined_call_operand.hbm [shape: bf16[512,128], index: 1, kind: input, shape index: {}]   ;;  %s3321_s2 = inlined_call_operand.hbm [shape: bf16[128,128], index: 2, kind: input, shape index: {}]   ;;  %s3322_s3 = inlined_call_operand.vmem [shape: f32[1,128], index: 3, kind: input, shape index: {}]   ;;  %s3323_s4 = inlined_call_operand.hbm [shape: bf16[512,128], index: 4, kind: output, shape index: {}]  }
   0x1   :  { %11 = vsyncpa [#allocation4 + $0x1], 0 }
   0x2   :  { %12 = vsyncpa [#allocation7], 0 }
   0x3   :  { %13 = vsyncpa [#allocation5], 0 }
   0x4   :  { %15 = vsyncpa [#allocation5 + $0x1], 0  ;;  %s2984_s15 = smov 0   ;;  %s2986_s16 = smov 0  }
   0x5   :  { %s2988_s17 = smov 0   ;;  %s2990_s18 = smov 0  }
   0x6   :  { %s2992_s19 = smov 0   ;;  %s2994_s20 = smov 0  }
   0x7 LB: > { %s1959_s21 = sadd.s32 4294967295, %s2947_s20   ;;  %s1960_s22 = sadd.s32 4294967294, %s2947_s20   ;;  %s2947_s20 = sphi %s2994_s20, %s21_s20   ;;  %s2943_s19 = sphi %s2992_s19, %s3343_s19   ;;  %s2939_s18 = sphi %s2990_s18, %s3342_s18   ;;  %s2935_s17 = sphi %s2988_s17, %s3341_s17   ;;  %s2931_s16 = sphi %s2986_s16, %s3340_s16   ;;  %s2927_s15 = sphi %s2984_s15, %s3339_s15  }
   0x8   : > { %p55_p0 = scmp.ne.s32.totalorder %s2931_s16, %s2927_s15  ;;  %p3018_p1 = scmp.eq.s32.totalorder %s1959_s21, 0 }
   0x9   : > { %p3022_p2 = scmp.eq.s32.totalorder %s1959_s21, 1  ;;  %p148_p3 = scmp.eq.s32.totalorder %s1960_s22, 1 }
   0xa   : > { %s3327_s23 = scalar_select %p3018_p1, 1, 0 }
   0xb   : > { %p3028_p4 = por %p3018_p1, %p55_p0  ;;  %p1961_p5 = scmp.ge.s32.totalorder %s2947_s20, 1 }
   0xc   : > { %p3033_p6 = por %p148_p3, %p55_p0  ;;  %p155_p7 = scmp.lt.s32.totalorder %s2947_s20, 3 }
   0xd   : > { %s3329_s25 = scalar_select %p3028_p4, 1, 0 }
   0xe   : > { %s3330_s26 = scalar_select %p3033_p6, 1, 0 }
   0xf   : > { %p3038_p8 = pnand %p1961_p5, %p155_p7  ;;  %s2949_s28 = smov [#allocation6]  }
  0x10   : > { %s167_s29 = sshll.u32 %s2949_s28, 4  ;;  %s2950_s5 = smov [#allocation8]   ;;  %s168_s29 = int_to_ptr.vmem [resolvable:$true] %s167_s29 }
  0x11   : > { %p2570_p9 = pneg %p3038_p8  ;;  %s180_s6 = sshll.u32 %s2950_s5, 4  ;;  %s181_s6 = int_to_ptr.vmem [resolvable:$true] %s180_s6 }
  0x12   : > { %s2794_s7 = scalar_lea.vmem %s168_s29, 4096  ;;  %p2802_p5 = scmp.lt.s32.totalorder %s168_s29, %s168_s29 }
  0x13   : > { %p3047_p11 = pnand %p2570_p9, %p3018_p1  ;;  %p2795_p13 = scmp.ne.s32.totalorder %s168_s29, %s2794_s7 }
  0x14   : > { %p2803_p7 = scmp.lt.s32.totalorder %s2794_s7, %s2794_s7 }
  0x15   : > { %p2785_p12 = pneg %p3047_p11 }
  0x16   : > { %p2804_p10 = por %p2803_p7, %p2802_p5 }
  0x17   : > { %p2797_p0 = pnand %p2795_p13, %p2785_p12 }
  0x19   : > { %p2798_p3 = pneg %p2797_p0 }
  0x1b   : > { %p2805_p9 = pnand %p2804_p10, %p2798_p3 }
  0x1d   : > { %2808 = shalt.err (!%p2805_p9)
}
  0x1e   : > { %s2951_s8 = smov 64   ;;  %s2952_s9 = smov 4  }
  0x1f   : > { %2573 = dma.hbm_to_vmem [thread:$0]  (!%p3047_p11), %s3320_s1, 4096, %s168_s29, [#allocation7], %s2951_s8, %s2951_s8, %s2952_s9  }
  0x20   : > { %s2820_s12 = scalar_lea.vmem %s181_s6, 1024  ;;  %p2828_p1 = scmp.lt.s32.totalorder %s181_s6, %s181_s6 }
  0x21   : > { %p2821_p6 = scmp.ne.s32.totalorder %s181_s6, %s2820_s12  ;;  %p2829_p4 = scmp.lt.s32.totalorder %s2820_s12, %s2820_s12 }
  0x23   : > { %p2823_p13 = pnand %p2821_p6, %p2785_p12  ;;  %p2830_p5 = por %p2829_p4, %p2828_p1 }
  0x25   : > { %p2824_p0 = pneg %p2823_p13 }
  0x27   : > { %p2831_p10 = pnand %p2830_p5, %p2824_p0 }
  0x29   : > { %2834 = shalt.err (!%p2831_p10)
}
  0x2a   : > { %2576 = dma.hbm_to_vmem [thread:$0]  (!%p3047_p11), %s3321_s2, 1024, %s181_s6, [#allocation7], %s2951_s8, %s2951_s8, %s2952_s9  }
  0x2b   : > { %s33_s21 = sadd.s32 1, %s2943_s19  ;;  %s42_s22 = sadd.s32 1, %s2935_s17 }
  0x2c   : > { %p35_p1 = scmp.ge.s32.totalorder %s33_s21, 2  ;;  %p49_p4 = scmp.ne.s32.totalorder %s2935_s17, %s2931_s16 }
  0x2d   : > { %p50_p6 = scmp.eq.s32.totalorder %s2947_s20, 0  ;;  %p2587_p12 = scmp.lt.s32.totalorder %s2947_s20, 2 }
  0x2e   : > { %s3345_s21 = smov (%p35_p1, %s33_s21), 0  ;;  %p3079_p7 = por %p3022_p2, %p49_p4 }
  0x2f   : > { %p51_p3 = por %p50_p6, %p49_p4  ;;  %s37_s29 = ssub.s32 %s2943_s19, %s3345_s21 }
  0x30   : > { %s197_s30 = sand.u32 1, %s2935_s17   ;;  %p40_p9 = scmp.eq.s32.totalorder %s37_s29, 0 }
  0x31   : > { %s1965_s5 = sshll.u32 %s197_s30, 9  ;;  %s2117_s6 = sshll.u32 %s2943_s19, 13 }
  0x32   : > { %s3088_s7 = scalar_select %p40_p9, %s2935_s17, %s42_s22  }
  0x33   : > { %s210_s10 = scalar_lea.hbm %s3319_s0, %s2117_s6  ;;  %s201_s11 = scalar_lea.vmem [#allocation3], %s1965_s5 }
  0x34   : > { %s211_s12 = sshll.u32 %s201_s11, 4  ;;  %p3095_p11 = pnand %p2587_p12, %p51_p3  ;;  %s212_s12 = int_to_ptr.vmem [resolvable:$true] %s211_s12 }
  0x35   : > { %s198_s13 = scalar_lea.sflag [#allocation4], %s197_s30  ;;  %s2848_s14 = scalar_lea.vmem %s212_s12, 8192 }
  0x36   : > { %p2837_p2 = pneg %p3095_p11  ;;  %p2849_p13 = scmp.ne.s32.totalorder %s212_s12, %s2848_s14 }
  0x37   : > { %s2953_s22 = smov [#allocation3]  }
  0x38   : > { %p2851_p0 = pnand %p2849_p13, %p2837_p2  ;;  %s2853_s29 = sshll.u32 %s2953_s22, 4  ;;  %s2854_s29 = int_to_ptr.vmem [resolvable:$false] %s2853_s29 }
  0x39   : > { %s2855_s6 = scalar_lea.vmem %s2854_s29, 16384  ;;  %p2856_p10 = scmp.lt.s32.totalorder %s212_s12, %s2854_s29 }
  0x3a   : > { %p2852_p5 = pneg %p2851_p0  ;;  %p2857_p1 = scmp.lt.s32.totalorder %s2855_s6, %s2848_s14 }
  0x3c   : > { %p2858_p4 = por %p2857_p1, %p2856_p10 }
  0x3e   : > { %p2859_p6 = pnand %p2858_p4, %p2852_p5 }
  0x40   : > { %2862 = shalt.err (!%p2859_p6)
}
  0x41   : > { %s2954_s5 = smov 256   ;;  %s2955_s8 = smov 16  }
  0x42   : > { %2580 = dma.hbm_to_vmem [thread:$0]  (!%p3095_p11), %s210_s10, 8192, %s212_s12, %s198_s13, %s2954_s5, %s2954_s5, %s2955_s8  }
  0x43   : > { %223 = sbr.rel (%p3038_p8) target bundleno = 685 (0x2ad), region = 36  ;;  %s3106_s30 = sand.u32 (!%p3038_p8), 1, %s2931_s16  }
  0x44   : > { %s1970_s9 = sshll.u32 (!%p3038_p8), %s3106_s30, 9  ;;  %s226_s11 = scalar_lea.sflag (!%p3038_p8), [#allocation4], %s3106_s30 }
  0x45   : > { %s3110_s14 = scalar_lea.vmem (!%p3038_p8), [#allocation3], %s1970_s9  ;;  %p3335_p12 = scmp.ne.s32.totalorder (!%p3038_p8), %s3329_s25, 0 }
  0x48   : > { %2914 = dma.done.wait (%p3335_p12), %s226_s11, 8192  }
  0x49   : > { %2916 = vsyncadd (%p3335_p12), %s226_s11, 4294959104  ;;  %p3336_p3 = scmp.ne.s32.totalorder %s3327_s23, 0 }
  0x4b   : > { %2918 = dma.done.wait (%p3336_p3), [#allocation7], 5120  }
  0x4c   : > { %2920 = vsyncadd (%p3336_p3), [#allocation7], 4294962176  ;;  %v2647_v0 = vld [vmem:[#allocation6 + $0x78] sm:$0xff]   ;;  %v2649_v2 = vld [vmem:[#allocation6 + $0x70] sm:$0xff]   ;;  %s1973_s27 = sshll.u32 %s3106_s30, 7  ;;  %s2150_s12 = sshll.u32 %s2939_s18, 11 }
  0x4d   : > { %v2648_v1 = vld [vmem:[#allocation6 + $0x38] sm:$0xff]   ;;  %2542 = vmatprep.subr.bf16.mxu1 %v2647_v0  ;;  %2246 = vmatprep.subr.bf16.mxu0 %v2647_v0  ;;  %v2650_v3 = vld [vmem:[#allocation6 + $0x30] sm:$0xff]   ;;  %v2651_v4 = vld [vmem:[#allocation6 + $0x68] sm:$0xff]   ;;  %s3218_s10 = scalar_lea.vmem [#allocation9], %s1973_s27  ;;  %s3267_s29 = scalar_lea.hbm %s3323_s4, %s2150_s12 }
  0x4e   : > { %2550 = vmatpush3.bf16.msra.mxu1 %v2648_v1  ;;  %2247 = vmatpush3.bf16.msra.mxu0 %v2648_v1  ;;  %v2652_v5 = vld [vmem:[#allocation6 + $0x28] sm:$0xff]   ;;  %v2653_v6 = vld [vmem:[#allocation6 + $0x60] sm:$0xff]   ;;  %v2655_v8 = vld [vmem:[#allocation6 + $0x58] sm:$0xff]   ;;  %s1854_s24 = sshll.u32 %s3218_s10, 4  ;;  %s1841_s6 = scalar_lea.sflag [#allocation5], %s3106_s30  ;;  %s3269_s24 = int_to_ptr.vmem [resolvable:$true] %s1854_s24 }
  0x4f   : > { %2543 = vmatprep.subr.bf16.mxu1 %v2649_v2  ;;  %2248 = vmatprep.subr.bf16.mxu0 %v2649_v2  ;;  %v2654_v7 = vld [vmem:[#allocation6 + $0x20] sm:$0xff]   ;;  %v2656_v9 = vld [vmem:[#allocation6 + $0x18] sm:$0xff]   ;;  %v2657_v10 = vld [vmem:[#allocation6 + $0x50] sm:$0xff]   ;;  %s2863_s5 = scalar_lea.vmem %s3269_s24, 2048  ;;  %s2956_s18 = smov [#allocation9]  }
  0x50   : > { %v2665_v11 = vld [vmem:[%s3110_s14 + $0x184] ss:$16 sps:$4 sm:$0xff]   ;;  %v2659_v13 = vld [vmem:[#allocation6 + $0x48] sm:$0xff]   ;;  %v2666_v17 = vld [vmem:[#allocation6 + $0xf8] sm:$0xff]   ;;  %p2864_p8 = scmp.ne.s32.totalorder %s3269_s24, %s2863_s5  ;;  %s2867_s8 = sshll.u32 %s2956_s18, 4  ;;  %s2868_s8 = int_to_ptr.vmem [resolvable:$false] %s2867_s8 }
  0x51   : > { %v2658_v12 = vld [vmem:[#allocation6 + $0x10] sm:$0xff]   ;;  %1107 = vmatprep.mubr.bf16.mxu1 %v2665_v11  ;;  %v2660_v14 = vld [vmem:[#allocation6 + $0x8] sm:$0xff]   ;;  %v2661_v15 = vld [vmem:[#allocation6 + $0x40] sm:$0xff]   ;;  %s2869_s9 = scalar_lea.vmem %s2868_s8, 4096  ;;  %p2870_p2 = scmp.lt.s32.totalorder %s3269_s24, %s2868_s8 }
  0x52   : > { %2551 = vmatpush3.bf16.msra.mxu1 %v2650_v3  ;;  %2249 = vmatpush3.bf16.msra.mxu0 %v2650_v3  ;;  %v2662_v16 = vld [vmem:[#allocation6] sm:$0xff]   ;;  %v2667_v19 = vld [vmem:[#allocation6 + $0xb8] sm:$0xff]   ;;  %v2668_v21 = vld [vmem:[#allocation6 + $0xf0] sm:$0xff]   ;;  %p2865_p9 = pnand %p2864_p8, %p3079_p7  ;;  %p2871_p13 = scmp.lt.s32.totalorder %s2869_s9, %s2863_s5 }
  0x53   : > { %2544 = vmatprep.subr.bf16.mxu1 %v2651_v4  ;;  %2250 = vmatprep.subr.bf16.mxu0 %v2651_v4  ;;  %v2663_v18 = vld [vmem:[%s3110_s14 + $0x180] ss:$16 sps:$4 sm:$0xff]   ;;  %v2670_v20 = vld [vmem:[%s3110_s14 + $0x1a4] ss:$16 sps:$4 sm:$0xff]   ;;  %v2673_v24 = vld [vmem:[#allocation6 + $0xe8] sm:$0xff]  }
  0x54   : > { %v2669_v22 = vld [vmem:[#allocation6 + $0xb0] sm:$0xff]   ;;  %v2674_v25 = vld [vmem:[#allocation6 + $0xa8] sm:$0xff]   ;;  %v2675_v28 = vld [vmem:[#allocation6 + $0xe0] sm:$0xff]   ;;  %p2866_p11 = pneg %p2865_p9  ;;  %p2872_p0 = por %p2871_p13, %p2870_p2 }
  0x55   : > { %v2672_v23 = vld [vmem:[%s3110_s14 + $0x1a0] ss:$16 sps:$4 sm:$0xff]   ;;  %v2693_v27 = vld [vmem:[%s3110_s14 + $0x4] ss:$16 sps:$4 sm:$0xff]   ;;  %v2680_v33 = vld [vmem:[#allocation6 + $0xd8] sm:$0xff]  }
  0x56   : > { %2552 = vmatpush3.bf16.msra.mxu1 %v2652_v5  ;;  %2251 = vmatpush3.bf16.msra.mxu0 %v2652_v5  ;;  %v2691_v26 = vld [vmem:[%s3110_s14] ss:$16 sps:$4 sm:$0xff]   ;;  %v2677_v29 = vld [vmem:[%s3110_s14 + $0x1c4] ss:$16 sps:$4 sm:$0xff]   ;;  %v2681_v36 = vld [vmem:[#allocation6 + $0x98] sm:$0xff]   ;;  %p2873_p5 = pnand %p2872_p0, %p2866_p11 }
  0x57   : > { %2545 = vmatprep.subr.bf16.mxu1 %v2653_v6  ;;  %2252 = vmatprep.subr.bf16.mxu0 %v2653_v6  ;;  %v2697_v30 = vld [vmem:[%s3110_s14 + $0x24] ss:$16 sps:$4 sm:$0xff]   ;;  %v2679_v32 = vld [vmem:[%s3110_s14 + $0x1c0] ss:$16 sps:$4 sm:$0xff]   ;;  %v2687_v41 = vld [vmem:[#allocation6 + $0xc8] sm:$0xff]  }
  0x58   : > { %1011 = vmatprep.mubr.bf16.mxu0 %v2693_v27  ;;  %v2676_v31 = vld [vmem:[#allocation6 + $0xa0] sm:$0xff]   ;;  %v2682_v38 = vld [vmem:[#allocation6 + $0xd0] sm:$0xff]   ;;  %v2688_v44 = vld [vmem:[#allocation6 + $0x88] sm:$0xff]  }
  0x59   : > { %v2701_v34 = vld [vmem:[%s3110_s14 + $0x20] ss:$16 sps:$4 sm:$0xff]   ;;  %v2703_v35 = vld [vmem:[%s3110_s14 + $0x44] ss:$16 sps:$4 sm:$0xff]   ;;  %v2696_v45 = vld [vmem:[%s3110_s14 + $0xc] ss:$16 sps:$4 sm:$0xff]  }
  0x5a   : > { %2553 = vmatpush3.bf16.msra.mxu1 %v2654_v7  ;;  %2253 = vmatpush3.bf16.msra.mxu0 %v2654_v7  ;;  %v2684_v37 = vld [vmem:[%s3110_s14 + $0x1e4] ss:$16 sps:$4 sm:$0xff]   ;;  %v2686_v40 = vld [vmem:[%s3110_s14 + $0x1e0] ss:$16 sps:$4 sm:$0xff]   ;;  %v2694_v48 = vld [vmem:[%s3110_s14 + $0x8] ss:$16 sps:$4 sm:$0xff]  }
  0x5b   : > { %2546 = vmatprep.subr.bf16.mxu1 %v2655_v8  ;;  %2254 = vmatprep.subr.bf16.mxu0 %v2655_v8  ;;  %v2683_v39 = vld [vmem:[#allocation6 + $0x90] sm:$0xff]   ;;  %v2689_v46 = vld [vmem:[#allocation6 + $0xc0] sm:$0xff]   ;;  %v2699_v51 = vld [vmem:[%s3110_s14 + $0x2c] ss:$16 sps:$4 sm:$0xff]  }
  0x5c   : > { %v2707_v42 = vld [vmem:[%s3110_s14 + $0x40] ss:$16 sps:$4 sm:$0xff]   ;;  %v2709_v43 = vld [vmem:[%s3110_s14 + $0x64] ss:$16 sps:$4 sm:$0xff]   ;;  %v2702_v53 = vld [vmem:[%s3110_s14 + $0x28] ss:$16 sps:$4 sm:$0xff]  }
  0x5d   : > { %v2690_v47 = vld [vmem:[#allocation6 + $0x80] sm:$0xff]   ;;  %v2705_v55 = vld [vmem:[%s3110_s14 + $0x4c] ss:$16 sps:$4 sm:$0xff]   ;;  %v2708_v57 = vld [vmem:[%s3110_s14 + $0x48] ss:$16 sps:$4 sm:$0xff]  }
  0x5e   : > { %2554 = vmatpush3.bf16.msra.mxu1 %v2656_v9  ;;  %2255 = vmatpush3.bf16.msra.mxu0 %v2656_v9  ;;  %v2713_v49 = vld [vmem:[%s3110_s14 + $0x60] ss:$16 sps:$4 sm:$0xff]   ;;  %v2715_v50 = vld [vmem:[%s3110_s14 + $0x84] ss:$16 sps:$4 sm:$0xff]   ;;  %v2711_v59 = vld [vmem:[%s3110_s14 + $0x6c] ss:$16 sps:$4 sm:$0xff]  }
  0x5f   : > { %2547 = vmatprep.subr.bf16.mxu1 %v2657_v10  ;;  %2256 = vmatprep.subr.bf16.mxu0 %v2657_v10  ;;  %v2719_v52 = vld [vmem:[%s3110_s14 + $0x80] ss:$16 sps:$4 sm:$0xff]   ;;  %v2721_v54 = vld [vmem:[%s3110_s14 + $0xa4] ss:$16 sps:$4 sm:$0xff]   ;;  %v2714_v61 = vld [vmem:[%s3110_s14 + $0x68] ss:$16 sps:$4 sm:$0xff]  }
  0x60   : > { %v2725_v56 = vld [vmem:[%s3110_s14 + $0xa0] ss:$16 sps:$4 sm:$0xff]   ;;  %v2727_v58 = vld [vmem:[%s3110_s14 + $0xc4] ss:$16 sps:$4 sm:$0xff]   ;;  %v2717_v63 = vld [vmem:[%s3110_s14 + $0x8c] ss:$16 sps:$4 sm:$0xff]  }
  0x61   : > { %v2731_v60 = vld [vmem:[%s3110_s14 + $0xc0] ss:$16 sps:$4 sm:$0xff]   ;;  %v2733_v62 = vld [vmem:[%s3110_s14 + $0xe4] ss:$16 sps:$4 sm:$0xff]   ;;  %v2720_v1 = vld [vmem:[%s3110_s14 + $0x88] ss:$16 sps:$4 sm:$0xff]  }
  0x62   : > { %2555 = vmatpush3.bf16.msra.mxu1 %v2658_v12  ;;  %2257 = vmatpush3.bf16.msra.mxu0 %v2658_v12  ;;  %v2737_v0 = vld [vmem:[%s3110_s14 + $0xe0] ss:$16 sps:$4 sm:$0xff]   ;;  %v2739_v2 = vld [vmem:[%s3110_s14 + $0x104] ss:$16 sps:$4 sm:$0xff]   ;;  %v2723_v3 = vld [vmem:[%s3110_s14 + $0xac] ss:$16 sps:$4 sm:$0xff]  }
  0x63   : > { %2548 = vmatprep.subr.bf16.mxu1 %v2659_v13  ;;  %2258 = vmatprep.subr.bf16.mxu0 %v2659_v13  ;;  %v2743_v4 = vld [vmem:[%s3110_s14 + $0x100] ss:$16 sps:$4 sm:$0xff]   ;;  %v2726_v5 = vld [vmem:[%s3110_s14 + $0xa8] ss:$16 sps:$4 sm:$0xff]   ;;  %v2745_v6 = vld [vmem:[%s3110_s14 + $0x124] ss:$16 sps:$4 sm:$0xff]  }
  0x64   : > { %v2729_v7 = vld [vmem:[%s3110_s14 + $0xcc] ss:$16 sps:$4 sm:$0xff]   ;;  %v2749_v8 = vld [vmem:[%s3110_s14 + $0x120] ss:$16 sps:$4 sm:$0xff]   ;;  %v2732_v9 = vld [vmem:[%s3110_s14 + $0xc8] ss:$16 sps:$4 sm:$0xff]  }
  0x65   : > { %v2751_v10 = vld [vmem:[%s3110_s14 + $0x144] ss:$16 sps:$4 sm:$0xff]   ;;  %v2775_v11 = vld [vmem:[#allocation8 + $0x38] sm:$0xff]   ;;  %v2755_v13 = vld [vmem:[%s3110_s14 + $0x140] ss:$16 sps:$4 sm:$0xff]  }
  0x66   : > { %2556 = vmatpush3.bf16.msra.mxu1 %v2660_v14  ;;  %2259 = vmatpush3.bf16.msra.mxu0 %v2660_v14  ;;  %v2735_v12 = vld [vmem:[%s3110_s14 + $0xec] ss:$16 sps:$4 sm:$0xff]   ;;  %v2738_v14 = vld [vmem:[%s3110_s14 + $0xe8] ss:$16 sps:$4 sm:$0xff]  }
  0x67   : > { %2549 = vmatprep.subr.bf16.mxu1 %v2661_v15  ;;  %2260 = vmatprep.subr.bf16.mxu0 %v2661_v15  ;;  %v2757_v15 = vld [vmem:[%s3110_s14 + $0x164] ss:$16 sps:$4 sm:$0xff]   ;;  %v2781_v27 = vld [vmem:[#allocation8 + $0x8] sm:$0xff]  }
  0x6a   : > { %2557 = vmatpush3.bf16.msra.mxu1 %v2662_v16  ;;  %2261 = vmatpush3.bf16.msra.mxu0 %v2662_v16  ;;  %v2741_v16 = vld [vmem:[%s3110_s14 + $0x10c] ss:$16 sps:$4 sm:$0xff]  }
  0x6b   : > { %2358 = vmatprep.subr.bf16.mxu1 %v2666_v17  ;;  %2494 = vmatprep.subr.bf16.mxu0 %v2775_v11  ;;  %v2776_v17 = vld [vmem:[#allocation8 + $0x30] sm:$0xff]  }
  0x6d   : > { %1108 = vmatmul.mubr.bf16.vlgmr.msra.gmra.mxu1 %v2663_v18  ;;  %1012 = vmatmul.mubr.bf16.vlgmr.msra.gmra.mxu0 %v2691_v26  ;;  %v2761_v18 = vld [vmem:[%s3110_s14 + $0x160] ss:$16 sps:$4 sm:$0xff]  }
  0x6e   : > { %2359 = vmatpush3.bf16.msra.mxu1 %v2667_v19  ;;  %1115 = vmatprep.mubr.bf16.mxu1 %v2670_v20  ;;  %v2777_v19 = vld [vmem:[#allocation8 + $0x28] sm:$0xff]   ;;  %v2780_v26 = vld [vmem:[#allocation8 + $0x10] sm:$0xff]  }
  0x6f   : > { %2360 = vmatprep.subr.bf16.mxu1 %v2668_v21  ;;  %1019 = vmatprep.mubr.bf16.mxu0 %v2697_v30  ;;  %v2744_v20 = vld [vmem:[%s3110_s14 + $0x108] ss:$16 sps:$4 sm:$0xff]   ;;  %v2747_v21 = vld [vmem:[%s3110_s14 + $0x12c] ss:$16 sps:$4 sm:$0xff]   ;;  %v2782_v30 = vld [vmem:[#allocation8] sm:$0xff]  }
  0x70   : > { %2495 = vmatpush3.bf16.msra.mxu0 %v2775_v11 }
  0x71   : > { %2496 = vmatprep.subr.bf16.mxu0 %v2776_v17 }
  0x72   : > { %2361 = vmatpush3.bf16.msra.mxu1 %v2669_v22  ;;  %v2778_v22 = vld [vmem:[#allocation8 + $0x20] sm:$0xff]  }
  0x73   : > { %2362 = vmatprep.subr.bf16.mxu1 %v2673_v24  ;;  %v2750_v24 = vld [vmem:[%s3110_s14 + $0x128] ss:$16 sps:$4 sm:$0xff]  }
  0x74   : > { %2497 = vmatpush3.bf16.msra.mxu0 %v2776_v17 }
  0x75   : > { %1116 = vmatmul.mubr.bf16.gmra.mxu1 %v2672_v23  ;;  %1020 = vmatmul.mubr.bf16.gmra.mxu0 %v2701_v34  ;;  %v2779_v23 = vld [vmem:[#allocation8 + $0x18] sm:$0xff]  }
  0x76   : > { %2363 = vmatpush3.bf16.msra.mxu1 %v2674_v25  ;;  %1123 = vmatprep.mubr.bf16.mxu1 %v2677_v29  ;;  %v2753_v25 = vld [vmem:[%s3110_s14 + $0x14c] ss:$16 sps:$4 sm:$0xff]  }
  0x77   : > { %2364 = vmatprep.subr.bf16.mxu1 %v2675_v28  ;;  %1027 = vmatprep.mubr.bf16.mxu0 %v2703_v35  ;;  %v2756_v28 = vld [vmem:[%s3110_s14 + $0x148] ss:$16 sps:$4 sm:$0xff]   ;;  %v2759_v29 = vld [vmem:[%s3110_s14 + $0x16c] ss:$16 sps:$4 sm:$0xff]  }
  0x78   : > { %2498 = vmatprep.subr.bf16.mxu0 %v2777_v19  ;;  %v2766_v34 = vld [vmem:[%s3110_s14 + $0x1ac] ss:$16 sps:$4 sm:$0xff]   ;;  %v2768_v35 = vld [vmem:[%s3110_s14 + $0x1a8] ss:$16 sps:$4 sm:$0xff]  }
  0x79   : > { %2499 = vmatpush3.bf16.msra.mxu0 %v2777_v19 }
  0x7a   : > { %2365 = vmatpush3.bf16.msra.mxu1 %v2676_v31  ;;  %2500 = vmatprep.subr.bf16.mxu0 %v2778_v22  ;;  %v2762_v31 = vld [vmem:[%s3110_s14 + $0x168] ss:$16 sps:$4 sm:$0xff]  }
  0x7b   : > { %2366 = vmatprep.subr.bf16.mxu1 %v2680_v33  ;;  %v2765_v33 = vld [vmem:[%s3110_s14 + $0x188] ss:$16 sps:$4 sm:$0xff]  }
  0x7d   : > { %1124 = vmatmul.mubr.bf16.gmra.mxu1 %v2679_v32  ;;  %1028 = vmatmul.mubr.bf16.gmra.mxu0 %v2707_v42  ;;  %v2763_v32 = vld [vmem:[%s3110_s14 + $0x18c] ss:$16 sps:$4 sm:$0xff]  }
  0x7e   : > { %2367 = vmatpush3.bf16.msra.mxu1 %v2681_v36  ;;  %1131 = vmatprep.mubr.bf16.mxu1 %v2684_v37  ;;  %v2769_v36 = vld [vmem:[%s3110_s14 + $0x1cc] ss:$16 sps:$4 sm:$0xff]   ;;  %v2771_v37 = vld [vmem:[%s3110_s14 + $0x1c8] ss:$16 sps:$4 sm:$0xff]  }
  0x7f   : > { %2368 = vmatprep.subr.bf16.mxu1 %v2682_v38  ;;  %1035 = vmatprep.mubr.bf16.mxu0 %v2709_v43  ;;  %v2772_v38 = vld [vmem:[%s3110_s14 + $0x1ec] ss:$16 sps:$4 sm:$0xff]  }
  0x80   : > { %2501 = vmatpush3.bf16.msra.mxu0 %v2778_v22 }
  0x81   : > { %2502 = vmatprep.subr.bf16.mxu0 %v2779_v23 }
  0x82   : > { %2369 = vmatpush3.bf16.msra.mxu1 %v2683_v39  ;;  %v2774_v39 = vld [vmem:[%s3110_s14 + $0x1e8] ss:$16 sps:$4 sm:$0xff]  }
  0x83   : > { %2370 = vmatprep.subr.bf16.mxu1 %v2687_v41 }
  0x84   : > { %2503 = vmatpush3.bf16.msra.mxu0 %v2779_v23 }
  0x85   : > { %1132 = vmatmul.mubr.bf16.gmra.mxu1 %v2686_v40  ;;  %1036 = vmatmul.mubr.bf16.gmra.mxu0 %v2713_v49 }
  0x86   : > { %2371 = vmatpush3.bf16.msra.mxu1 %v2688_v44  ;;  %1172 = vmatprep.mubr.bf16.mxu1 %v2696_v45 }
  0x87   : > { %2372 = vmatprep.subr.bf16.mxu1 %v2689_v46  ;;  %1043 = vmatprep.mubr.bf16.mxu0 %v2715_v50 }
  0x88   : > { %2504 = vmatprep.subr.bf16.mxu0 %v2780_v26 }
  0x89   : > { %2505 = vmatpush3.bf16.msra.mxu0 %v2780_v26 }
  0x8a   : > { %2373 = vmatpush3.bf16.msra.mxu1 %v2690_v47  ;;  %2506 = vmatprep.subr.bf16.mxu0 %v2781_v27 }
  0x8d   : > { %1173 = vmatmul.mubr.bf16.vlgmr.msra.gmra.mxu1 %v2694_v48  ;;  %1044 = vmatmul.mubr.bf16.gmra.mxu0 %v2719_v52 }
  0x8e   : > { %1180 = vmatprep.mubr.bf16.mxu1 %v2699_v51  ;;  %1051 = vmatprep.mubr.bf16.mxu0 %v2721_v54 }
  0x8f   : > { %2507 = vmatpush3.bf16.msra.mxu0 %v2781_v27 }
  0x90   : > { %2508 = vmatprep.subr.bf16.mxu0 %v2782_v30 }
  0x93   : > { %2509 = vmatpush3.bf16.msra.mxu0 %v2782_v30 }
  0x95   : > { %1181 = vmatmul.mubr.bf16.gmra.mxu1 %v2702_v53  ;;  %1052 = vmatmul.mubr.bf16.gmra.mxu0 %v2725_v56 }
  0x96   : > { %1188 = vmatprep.mubr.bf16.mxu1 %v2705_v55  ;;  %1059 = vmatprep.mubr.bf16.mxu0 %v2727_v58 }
  0x9d   : > { %1189 = vmatmul.mubr.bf16.gmra.mxu1 %v2708_v57  ;;  %1060 = vmatmul.mubr.bf16.gmra.mxu0 %v2731_v60 }
  0x9e   : > { %1196 = vmatprep.mubr.bf16.mxu1 %v2711_v59  ;;  %1067 = vmatprep.mubr.bf16.mxu0 %v2733_v62 }
  0xa5   : > { %1197 = vmatmul.mubr.bf16.gmra.mxu1 %v2714_v61  ;;  %1068 = vmatmul.mubr.bf16.gmra.mxu0 %v2737_v0 }
  0xa6   : > { %1204 = vmatprep.mubr.bf16.mxu1 %v2717_v63  ;;  %1075 = vmatprep.mubr.bf16.mxu0 %v2739_v2 }
  0xad   : > { %1205 = vmatmul.mubr.bf16.gmra.mxu1 %v2720_v1  ;;  %1076 = vmatmul.mubr.bf16.gmra.mxu0 %v2743_v4 }
  0xae   : > { %1212 = vmatprep.mubr.bf16.mxu1 %v2723_v3  ;;  %1083 = vmatprep.mubr.bf16.mxu0 %v2745_v6 }
  0xb5   : > { %1213 = vmatmul.mubr.bf16.gmra.mxu1 %v2726_v5  ;;  %1084 = vmatmul.mubr.bf16.gmra.mxu0 %v2749_v8 }
  0xb6   : > { %1220 = vmatprep.mubr.bf16.mxu1 %v2729_v7  ;;  %1091 = vmatprep.mubr.bf16.mxu0 %v2751_v10 }
  0xbd   : > { %1221 = vmatmul.mubr.bf16.gmra.mxu1 %v2732_v9  ;;  %1092 = vmatmul.mubr.bf16.gmra.mxu0 %v2755_v13 }
  0xbe   : > { %1228 = vmatprep.mubr.bf16.mxu1 %v2735_v12  ;;  %1099 = vmatprep.mubr.bf16.mxu0 %v2757_v15 }
  0xc5   : > { %1229 = vmatmul.mubr.bf16.gmra.mxu1 %v2738_v14  ;;  %1100 = vmatmul.mubr.bf16.gmra.mxu0 %v2761_v18 }
  0xc6   : > { %1236 = vmatprep.mubr.bf16.mxu1 %v2741_v16 }
  0xcd   : > { %1237 = vmatmul.mubr.bf16.gmra.mxu1 %v2744_v20 }
  0xce   : > { %1244 = vmatprep.mubr.bf16.mxu1 %v2747_v21 }
  0xd5   : > { %1245 = vmatmul.mubr.bf16.gmra.mxu1 %v2750_v24 }
  0xd6   : > { %1252 = vmatprep.mubr.bf16.mxu1 %v2753_v25 }
  0xdd   : > { %1253 = vmatmul.mubr.bf16.gmra.mxu1 %v2756_v28 }
  0xde   : > { %1260 = vmatprep.mubr.bf16.mxu1 %v2759_v29 }
  0xe5   : > { %1261 = vmatmul.mubr.bf16.gmra.mxu1 %v2762_v31 }
  0xe6   : > { %1268 = vmatprep.mubr.bf16.mxu1 %v2763_v32 }
  0xed   : > { %1269 = vmatmul.mubr.bf16.gmra.mxu1 %v2765_v33 }
  0xee   : > { %1276 = vmatprep.mubr.bf16.mxu1 %v2766_v34 }
  0xf5   : > { %1277 = vmatmul.mubr.bf16.gmra.mxu1 %v2768_v35 }
  0xf6   : > { %1284 = vmatprep.mubr.bf16.mxu1 %v2769_v36 }
  0xfd   : > { %1285 = vmatmul.mubr.bf16.gmra.mxu1 %v2771_v37 }
  0xfe   : > { %1292 = vmatprep.mubr.bf16.mxu1 %v2772_v38 }
 0x105   : > { %1293 = vmatmul.mubr.bf16.gmra.mxu1 %v2774_v39 }
 0x12d   : > { %v2334_v40 = vpop.f32.mrf.mxu1  ;;  %v2262_v46 = vpop.f32.mrf.mxu0 }
 0x12f   : > { %v2335_v41 = vpop.f32.mrf.mxu1  ;;  %v2263_v48 = vpop.f32.mrf.mxu0 }
 0x130   : > { %v3184_v42 = vadd.f32 %v2335_v41, %v2334_v40  ;;  %v2264_v18 = vadd.f32 %v2263_v48, %v2262_v46 }
 0x131   : > { %v2337_v43 = vpop.f32.mrf.mxu1  ;;  %v2265_v51 = vpop.f32.mrf.mxu0 }
 0x133   : > { %v2338_v44 = vpop.f32.mrf.mxu1  ;;  %v2266_v53 = vpop.f32.mrf.mxu0 }
 0x134   : > { %v3186_v45 = vadd.f32 %v2338_v44, %v2337_v43  ;;  %v2267_v20 = vadd.f32 %v2266_v53, %v2265_v51 }
 0x135   : > { %v2340_v47 = vpop.f32.mrf.mxu1  ;;  %v2268_v56 = vpop.f32.mrf.mxu0 }
 0x137   : > { %v2341_v49 = vpop.f32.mrf.mxu1  ;;  %v2269_v58 = vpop.f32.mrf.mxu0 }
 0x138   : > { %v3188_v50 = vadd.f32 %v2341_v49, %v2340_v47  ;;  %v2270_v33 = vadd.f32 %v2269_v58, %v2268_v56 }
 0x139   : > { %v2343_v52 = vpop.f32.mrf.mxu1  ;;  %v2271_v61 = vpop.f32.mrf.mxu0 }
 0x13b   : > { %v2344_v54 = vpop.f32.mrf.mxu1  ;;  %v2272_v63 = vpop.f32.mrf.mxu0 }
 0x13c   : > { %v3190_v55 = vadd.f32 %v2344_v54, %v2343_v52  ;;  %v2273_v35 = vadd.f32 %v2272_v63, %v2271_v61 }
 0x13d   : > { %v2346_v57 = vpop.f32.mrf.mxu1  ;;  %v2274_v2 = vpop.f32.mrf.mxu0 }
 0x13f   : > { %v2347_v59 = vpop.f32.mrf.mxu1  ;;  %v2275_v4 = vpop.f32.mrf.mxu0 }
 0x140   : > { %v3192_v60 = vadd.f32 %v2347_v59, %v2346_v57  ;;  %v2276_v51 = vadd.f32 %v2275_v4, %v2274_v2 }
 0x141   : > { %v2349_v62 = vpop.f32.mrf.mxu1  ;;  %v2277_v7 = vpop.f32.mrf.mxu0 }
 0x143   : > { %v2350_v0 = vpop.f32.mrf.mxu1  ;;  %v2278_v9 = vpop.f32.mrf.mxu0 }
 0x144   : > { %v3194_v1 = vadd.f32 %v2350_v0, %v2349_v62  ;;  %v2279_v53 = vadd.f32 %v2278_v9, %v2277_v7 }
 0x145   : > { %v2352_v3 = vpop.f32.mrf.mxu1  ;;  %v2280_v12 = vpop.f32.mrf.mxu0 }
 0x147   : > { %v2353_v5 = vpop.f32.mrf.mxu1  ;;  %v2281_v14 = vpop.f32.mrf.mxu0 }
 0x148   : > { %v3196_v6 = vadd.f32 %v2353_v5, %v2352_v3 }
 0x149   : > { %v2355_v8 = vpop.f32.mrf.mxu1  ;;  %v2283_v16 = vpop.f32.mrf.mxu0 }
 0x14b   : > { %v2356_v10 = vpop.f32.mrf.mxu1  ;;  %v2284_v21 = vpop.f32.mrf.mxu0 }
 0x14c   : > { %v3198_v11 = vadd.f32 %v2356_v10, %v2355_v8  ;;  %v2282_v10 = vadd.f32 %v2281_v14, %v2280_v12 }
 0x14d   : > { %v2374_v13 = vpop.f32.mrf.mxu1  ;;  %v2286_v24 = vpop.f32.mrf.mxu0 }
 0x14f   : > { %v2375_v15 = vpop.f32.mrf.mxu1  ;;  %v2287_v28 = vpop.f32.mrf.mxu0 }
 0x150   : > { %v2376_v19 = vadd.f32 %v2375_v15, %v2374_v13  ;;  %v2285_v15 = vadd.f32 %v2284_v21, %v2283_v16 }
 0x151   : > { %v2377_v17 = vpop.f32.mrf.mxu1  ;;  %v2289_v31 = vpop.f32.mrf.mxu0 }
 0x152   : > { %v1175_v26 = vadd.f32 %v2376_v19, %v2264_v18 }
 0x153   : > { %v2378_v22 = vpop.f32.mrf.mxu1  ;;  %v2290_v36 = vpop.f32.mrf.mxu0 }
 0x154   : > { %v2379_v23 = vadd.f32 %v2378_v22, %v2377_v17 }
 0x155   : > { %v2380_v25 = vpop.f32.mrf.mxu1  ;;  %v2292_v39 = vpop.f32.mrf.mxu0 }
 0x156   : > { %v1178_v27 = vadd.f32 %v2379_v23, %v2267_v20 }
 0x157   : > { %v2381_v29 = vpop.f32.mrf.mxu1  ;;  %v2293_v44 = vpop.f32.mrf.mxu0 }
 0x158   : > { %v1400_v30 = vpack.c.bf16 %v1178_v27, %v1175_v26  ;;  %v2382_v34 = vadd.f32 %v2381_v29, %v2380_v25  ;;  %v2288_v27 = vadd.f32 %v2287_v28, %v2286_v24 }
 0x159   : > { %v2383_v32 = vpop.f32.mrf.mxu1  ;;  %v2295_v48 = vpop.f32.mrf.mxu0 }
 0x15a   : > { %2510 = vmatprep.mubr.bf16.mxu0 %v1400_v30  ;;  %v1183_v41 = vadd.f32 %v2382_v34, %v2270_v33  ;;  %v2291_v30 = vadd.f32 %v2290_v36, %v2289_v31 }
 0x15b   : > { %v2384_v37 = vpop.f32.mrf.mxu1  ;;  %v2296_v54 = vpop.f32.mrf.mxu0 }
 0x15c   : > { %v2385_v38 = vadd.f32 %v2384_v37, %v2383_v32 }
 0x15d   : > { %v2386_v40 = vpop.f32.mrf.mxu1  ;;  %v2298_v58 = vpop.f32.mrf.mxu0 }
 0x15e   : > { %v1186_v43 = vadd.f32 %v2385_v38, %v2273_v35 }
 0x15f   : > { %v2387_v46 = vpop.f32.mrf.mxu1  ;;  %v2299_v63 = vpop.f32.mrf.mxu0 }
 0x160   : > { %v1401_v47 = vpack.c.bf16 %v1186_v43, %v1183_v41  ;;  %v2388_v52 = vadd.f32 %v2387_v46, %v2386_v40  ;;  %v2294_v43 = vadd.f32 %v2293_v44, %v2292_v39 }
 0x161   : > { %v2389_v49 = vpop.f32.mrf.mxu1  ;;  %v2301_v5 = vpop.f32.mrf.mxu0 }
 0x162   : > { %2511 = vmatmul.mubr.bf16.vlgmr.msra.gmra.mxu0 %v1401_v47  ;;  %v1191_v61 = vadd.f32 %v2388_v52, %v2276_v51  ;;  %v2297_v47 = vadd.f32 %v2296_v54, %v2295_v48 }
 0x163   : > { %v2390_v56 = vpop.f32.mrf.mxu1  ;;  %v2302_v2 = vpop.f32.mrf.mxu0 }
 0x164   : > { %v2391_v57 = vadd.f32 %v2390_v56, %v2389_v49 }
 0x165   : > { %v2392_v59 = vpop.f32.mrf.mxu1  ;;  %v2304_v7 = vpop.f32.mrf.mxu0 }
 0x166   : > { %v1194_v62 = vadd.f32 %v2391_v57, %v2279_v53 }
 0x167   : > { %v2393_v0 = vpop.f32.mrf.mxu1  ;;  %v2305_v20 = vpop.f32.mrf.mxu0 }
 0x168   : > { %v1402_v3 = vpack.c.bf16 %v1194_v62, %v1191_v61  ;;  %v2394_v13 = vadd.f32 %v2393_v0, %v2392_v59  ;;  %v2300_v61 = vadd.f32 %v2299_v63, %v2298_v58  ;;  %v2303_v0 = vadd.f32 %v2302_v2, %v2301_v5 }
 0x169   : > { %v2395_v8 = vpop.f32.mrf.mxu1  ;;  %v2307_v25 = vpop.f32.mrf.mxu0 }
 0x16a   : > { %2514 = vmatprep.mubr.bf16.mxu0 %v1402_v3  ;;  %v1199_v18 = vadd.f32 %v2394_v13, %v2282_v10 }
 0x16b   : > { %v2396_v4 = vpop.f32.mrf.mxu1  ;;  %v2308_v12 = vpop.f32.mrf.mxu0 }
 0x16c   : > { %v2397_v17 = vadd.f32 %v2396_v4, %v2395_v8 }
 0x16d   : > { %v2398_v9 = vpop.f32.mrf.mxu1  ;;  %v2310_v16 = vpop.f32.mrf.mxu0 }
 0x16e   : > { %v1202_v19 = vadd.f32 %v2397_v17, %v2285_v15  ;;  %v2306_v17 = vadd.f32 %v2305_v20, %v2304_v7 }
 0x16f   : > { %v2399_v22 = vpop.f32.mrf.mxu1  ;;  %v2311_v35 = vpop.f32.mrf.mxu0 }
 0x170   : > { %v1403_v23 = vpack.c.bf16 %v1202_v19, %v1199_v18  ;;  %v2400_v29 = vadd.f32 %v2399_v22, %v2398_v9  ;;  %v2309_v18 = vadd.f32 %v2308_v12, %v2307_v25 }
 0x171   : > { %v2401_v26 = vpop.f32.mrf.mxu1  ;;  %v2313_v40 = vpop.f32.mrf.mxu0 }
 0x172   : > { %2515 = vmatmul.mubr.bf16.gmra.mxu0 %v1403_v23  ;;  %v1207_v33 = vadd.f32 %v2400_v29, %v2288_v27 }
 0x173   : > { %v2402_v14 = vpop.f32.mrf.mxu1  ;;  %v2314_v24 = vpop.f32.mrf.mxu0 }
 0x174   : > { %v2403_v32 = vadd.f32 %v2402_v14, %v2401_v26 }
 0x175   : > { %v2404_v21 = vpop.f32.mrf.mxu1  ;;  %v2316_v31 = vpop.f32.mrf.mxu0 }
 0x176   : > { %v1210_v34 = vadd.f32 %v2403_v32, %v2291_v30  ;;  %v2312_v30 = vadd.f32 %v2311_v35, %v2310_v16  ;;  %v2315_v32 = vadd.f32 %v2314_v24, %v2313_v40 }
 0x177   : > { %v2405_v37 = vpop.f32.mrf.mxu1  ;;  %v2317_v56 = vpop.f32.mrf.mxu0 }
 0x178   : > { %v1404_v38 = vpack.c.bf16 %v1210_v34, %v1207_v33  ;;  %v2406_v46 = vadd.f32 %v2405_v37, %v2404_v21 }
 0x179   : > { %v2407_v41 = vpop.f32.mrf.mxu1  ;;  %v2319_v39 = vpop.f32.mrf.mxu0 }
 0x17a   : > { %2518 = vmatprep.mubr.bf16.mxu0 %v1404_v38  ;;  %v1215_v51 = vadd.f32 %v2406_v46, %v2294_v43  ;;  %v2318_v43 = vadd.f32 %v2317_v56, %v2316_v31 }
 0x17b   : > { %v2408_v28 = vpop.f32.mrf.mxu1  ;;  %v2320_v13 = vpop.f32.mrf.mxu0 }
 0x17c   : > { %v2409_v49 = vadd.f32 %v2408_v28, %v2407_v41 }
 0x17d   : > { %v2410_v36 = vpop.f32.mrf.mxu1  ;;  %v2322_v22 = vpop.f32.mrf.mxu0 }
 0x17e   : > { %v1218_v52 = vadd.f32 %v2409_v49, %v2297_v47  ;;  %v2321_v47 = vadd.f32 %v2320_v13, %v2319_v39 }
 0x17f   : > { %v2411_v53 = vpop.f32.mrf.mxu1  ;;  %v2323_v26 = vpop.f32.mrf.mxu0 }
 0x180   : > { %v1405_v57 = vpack.c.bf16 %v1218_v52, %v1215_v51  ;;  %v2412_v62 = vadd.f32 %v2411_v53, %v2410_v36 }
 0x181   : > { %v2413_v59 = vpop.f32.mrf.mxu1  ;;  %v2325_v33 = vpop.f32.mrf.mxu0 }
 0x182   : > { %2519 = vmatmul.mubr.bf16.gmra.mxu0 %v1405_v57  ;;  %v1223_v48 = vadd.f32 %v2412_v62, %v2300_v61  ;;  %v2324_v57 = vadd.f32 %v2323_v26, %v2322_v22 }
 0x183   : > { %v2414_v3 = vpop.f32.mrf.mxu1  ;;  %v2326_v37 = vpop.f32.mrf.mxu0 }
 0x184   : > { %v2415_v44 = vadd.f32 %v2414_v3, %v2413_v59  ;;  %v2327_v61 = vadd.f32 %v2326_v37, %v2325_v33 }
 0x185   : > { %v2416_v8 = vpop.f32.mrf.mxu1  ;;  %v2328_v49 = vpop.f32.mrf.mxu0 }
 0x186   : > { %v1226_v54 = vadd.f32 %v2415_v44, %v2303_v0 }
 0x187   : > { %v2417_v10 = vpop.f32.mrf.mxu1  ;;  %v2329_v51 = vpop.f32.mrf.mxu0 }
 0x188   : > { %v1406_v15 = vpack.c.bf16 %v1226_v54, %v1223_v48  ;;  %v2418_v9 = vadd.f32 %v2417_v10, %v2416_v8  ;;  %v2330_v10 = vadd.f32 %v2329_v51, %v2328_v49 }
 0x189   : > { %v2419_v4 = vpop.f32.mrf.mxu1  ;;  %v2331_v0 = vpop.f32.mrf.mxu0 }
 0x18a   : > { %2522 = vmatprep.mubr.bf16.mxu0 %v1406_v15  ;;  %v1231_v23 = vadd.f32 %v2418_v9, %v2306_v17 }
 0x18b   : > { %v2420_v19 = vpop.f32.mrf.mxu1  ;;  %v2332_v8 = vpop.f32.mrf.mxu0 }
 0x18c   : > { %v2421_v58 = vadd.f32 %v2420_v19, %v2419_v4  ;;  %v2333_v15 = vadd.f32 %v2332_v8, %v2331_v0 }
 0x18d   : > { %v2422_v63 = vpop.f32.mrf.mxu1 }
 0x18e   : > { %v1234_v5 = vadd.f32 %v2421_v58, %v2309_v18 }
 0x18f   : > { %v2423_v2 = vpop.f32.mrf.mxu1 }
 0x190   : > { %v1407_v27 = vpack.c.bf16 %v1234_v5, %v1231_v23  ;;  %v2424_v14 = vadd.f32 %v2423_v2, %v2422_v63 }
 0x191   : > { %v2425_v29 = vpop.f32.mrf.mxu1 }
 0x192   : > { %2523 = vmatmul.mubr.bf16.gmra.mxu0 %v1407_v27  ;;  %v1239_v34 = vadd.f32 %v2424_v14, %v2312_v30 }
 0x193   : > { %v2426_v21 = vpop.f32.mrf.mxu1 }
 0x194   : > { %v2427_v7 = vadd.f32 %v2426_v21, %v2425_v29 }
 0x195   : > { %v2428_v20 = vpop.f32.mrf.mxu1 }
 0x196   : > { %v1242_v25 = vadd.f32 %v2427_v7, %v2315_v32 }
 0x197   : > { %v2429_v12 = vpop.f32.mrf.mxu1 }
 0x198   : > { %v1408_v38 = vpack.c.bf16 %v1242_v25, %v1239_v34  ;;  %v2430_v46 = vadd.f32 %v2429_v12, %v2428_v20 }
 0x199   : > { %v2431_v41 = vpop.f32.mrf.mxu1 }
 0x19a   : > { %2526 = vmatprep.mubr.bf16.mxu0 %v1408_v38  ;;  %v1247_v36 = vadd.f32 %v2430_v46, %v2318_v43 }
 0x19b   : > { %v2432_v28 = vpop.f32.mrf.mxu1 }
 0x19c   : > { %v2433_v16 = vadd.f32 %v2432_v28, %v2431_v41 }
 0x19d   : > { %v2434_v35 = vpop.f32.mrf.mxu1 }
 0x19e   : > { %v1250_v40 = vadd.f32 %v2433_v16, %v2321_v47 }
 0x19f   : > { %v2435_v24 = vpop.f32.mrf.mxu1 }
 0x1a0   : > { %v1409_v52 = vpack.c.bf16 %v1250_v40, %v1247_v36  ;;  %v2436_v59 = vadd.f32 %v2435_v24, %v2434_v35 }
 0x1a1   : > { %v2437_v53 = vpop.f32.mrf.mxu1 }
 0x1a2   : > { %2527 = vmatmul.mubr.bf16.gmra.mxu0 %v1409_v52  ;;  %v1255_v3 = vadd.f32 %v2436_v59, %v2324_v57 }
 0x1a3   : > { %v2438_v62 = vpop.f32.mrf.mxu1 }
 0x1a4   : > { %v2439_v31 = vadd.f32 %v2438_v62, %v2437_v53 }
 0x1a5   : > { %v2440_v56 = vpop.f32.mrf.mxu1 }
 0x1a6   : > { %v1258_v39 = vadd.f32 %v2439_v31, %v2327_v61 }
 0x1a7   : > { %v2441_v44 = vpop.f32.mrf.mxu1 }
 0x1a8   : > { %v1410_v48 = vpack.c.bf16 %v1258_v39, %v1255_v3  ;;  %v2442_v13 = vadd.f32 %v2441_v44, %v2440_v56 }
 0x1a9   : > { %v2443_v54 = vpop.f32.mrf.mxu1 }
 0x1aa   : > { %2530 = vmatprep.mubr.bf16.mxu0 %v1410_v48  ;;  %v1263_v18 = vadd.f32 %v2442_v13, %v2330_v10 }
 0x1ab   : > { %v2444_v4 = vpop.f32.mrf.mxu1 }
 0x1ac   : > { %v2445_v17 = vadd.f32 %v2444_v4, %v2443_v54 }
 0x1ad   : > { %v2446_v9 = vpop.f32.mrf.mxu1 }
 0x1ae   : > { %v1266_v19 = vadd.f32 %v2445_v17, %v2333_v15 }
 0x1af   : > { %v2447_v22 = vpop.f32.mrf.mxu1 }
 0x1b0   : > { %v1411_v58 = vpack.c.bf16 %v1266_v19, %v1263_v18  ;;  %v2448_v23 = vadd.f32 %v2447_v22, %v2446_v9 }
 0x1b1   : > { %v2449_v63 = vpop.f32.mrf.mxu1 }
 0x1b2   : > { %2531 = vmatmul.mubr.bf16.gmra.mxu0 %v1411_v58  ;;  %v1271_v27 = vadd.f32 %v2448_v23, %v3184_v42 }
 0x1b3   : > { %v2450_v5 = vpop.f32.mrf.mxu1 }
 0x1b4   : > { %v2451_v2 = vadd.f32 %v2450_v5, %v2449_v63 }
 0x1b5   : > { %v2452_v26 = vpop.f32.mrf.mxu1 }
 0x1b6   : > { %v1274_v29 = vadd.f32 %v2451_v2, %v3186_v45 }
 0x1b7   : > { %v2453_v30 = vpop.f32.mrf.mxu1 }
 0x1b8   : > { %v1412_v14 = vpack.c.bf16 %v1274_v29, %v1271_v27  ;;  %v2454_v21 = vadd.f32 %v2453_v30, %v2452_v26 }
 0x1b9   : > { %v2455_v32 = vpop.f32.mrf.mxu1 }
 0x1ba   : > { %2534 = vmatprep.mubr.bf16.mxu0 %v1412_v14  ;;  %v1279_v34 = vadd.f32 %v2454_v21, %v3188_v50 }
 0x1bb   : > { %v2456_v33 = vpop.f32.mrf.mxu1 }
 0x1bc   : > { %v2457_v7 = vadd.f32 %v2456_v33, %v2455_v32 }
 0x1bd   : > { %v2458_v20 = vpop.f32.mrf.mxu1 }
 0x1be   : > { %v1282_v25 = vadd.f32 %v2457_v7, %v3190_v55 }
 0x1bf   : > { %v2459_v12 = vpop.f32.mrf.mxu1 }
 0x1c0   : > { %v1413_v37 = vpack.c.bf16 %v1282_v25, %v1279_v34  ;;  %v2460_v41 = vadd.f32 %v2459_v12, %v2458_v20 }
 0x1c1   : > { %v2461_v38 = vpop.f32.mrf.mxu1 }
 0x1c2   : > { %2535 = vmatmul.mubr.bf16.gmra.mxu0 %v1413_v37  ;;  %v1287_v46 = vadd.f32 %v2460_v41, %v3192_v60  ;;  %v3211_v60 = vld [vmem:[%s3322_s3] ss:$0 sm:$0xff] }
 0x1c3   : > { %v2462_v42 = vpop.f32.mrf.mxu1 }
 0x1c4   : > { %v2463_v43 = vadd.f32 %v2462_v42, %v2461_v38 }
 0x1c5   : > { %v2464_v45 = vpop.f32.mrf.mxu1 }
 0x1c6   : > { %v1290_v47 = vadd.f32 %v2463_v43, %v3194_v1 }
 0x1c7   : > { %v2465_v28 = vpop.f32.mrf.mxu1 }
 0x1c8   : > { %v1414_v49 = vpack.c.bf16 %v1290_v47, %v1287_v46  ;;  %v2466_v35 = vadd.f32 %v2465_v28, %v2464_v45 }
 0x1c9   : > { %v2467_v16 = vpop.f32.mrf.mxu1 }
 0x1ca   : > { %2538 = vmatprep.mubr.bf16.mxu0 %v1414_v49  ;;  %v1295_v36 = vadd.f32 %v2466_v35, %v3196_v6 }
 0x1cb   : > { %v2468_v50 = vpop.f32.mrf.mxu1 }
 0x1cc   : > { %v2469_v55 = vadd.f32 %v2468_v50, %v2467_v16 }
 0x1ce   : > { %v1298_v40 = vadd.f32 %v2469_v55, %v3198_v11 }
 0x1d0   : > { %v1415_v24 = vpack.c.bf16 %v1298_v40, %v1295_v36 }
 0x1d2   : > { %2539 = vmatmul.mubr.bf16.gmra.mxu0 %v1415_v24 }
 0x222   : > { %v2512_v51 = vpop.f32.mrf.mxu0 }
 0x223   : > { %v1530_v52 = vadd.f32 %v2512_v51, %v3211_v60 }
 0x224   : > { %v1521_v1 = vpop.f32.mrf.mxu0 }
 0x225   : > { %v1522_v57 = vadd.f32 %v3211_v60, %v1521_v1  ;;  %v1650_v61 = vmax.f32 %v1530_v52, 0.0 }
 0x226   : > { %v2513_v53 = vpop.f32.mrf.mxu0 }
 0x227   : > { %v1533_v59 = vadd.f32 %v2513_v53, %v3211_v60  ;;  %v1648_v0 = vmax.f32 %v1522_v57, 0.0 }
 0x228   : > { %v1524_v6 = vpop.f32.mrf.mxu0 }
 0x229   : > { %v1651_v11 = vmax.f32 %v1533_v59, 0.0  ;;  %v1525_v62 = vadd.f32 %v3211_v60, %v1524_v6 }
 0x22b   : > { %v2159_v31 = vpack.c.bf16 %v1651_v11, %v1650_v61  ;;  %v1649_v56 = vmax.f32 %v1525_v62, 0.0 }
 0x22d   : > { %2231 = vst [vmem:[%s3218_s10 + $0x8] sm:$0xff] %v2159_v31   ;;  %v2154_v3 = vpack.c.bf16 %v1649_v56, %v1648_v0 }
 0x22f   : > { %2155 = vst [vmem:[%s3218_s10] sm:$0xff] %v2154_v3  }
 0x232   : > { %v2516_v39 = vpop.f32.mrf.mxu0 }
 0x233   : > { %v1546_v8 = vadd.f32 %v2516_v39, %v3211_v60 }
 0x234   : > { %v1537_v44 = vpop.f32.mrf.mxu0 }
 0x235   : > { %v1538_v54 = vadd.f32 %v3211_v60, %v1537_v44  ;;  %v1654_v15 = vmax.f32 %v1546_v8, 0.0 }
 0x236   : > { %v2517_v48 = vpop.f32.mrf.mxu0 }
 0x237   : > { %v1549_v10 = vadd.f32 %v2517_v48, %v3211_v60  ;;  %v1652_v9 = vmax.f32 %v1538_v54, 0.0 }
 0x238   : > { %v1540_v13 = vpop.f32.mrf.mxu0 }
 0x239   : > { %v1655_v4 = vmax.f32 %v1549_v10, 0.0  ;;  %v1541_v17 = vadd.f32 %v3211_v60, %v1540_v13 }
 0x23b   : > { %v2169_v18 = vpack.c.bf16 %v1655_v4, %v1654_v15  ;;  %v1653_v19 = vmax.f32 %v1541_v17, 0.0 }
 0x23d   : > { %2233 = vst [vmem:[%s3218_s10 + $0x18] sm:$0xff] %v2169_v18   ;;  %v2164_v22 = vpack.c.bf16 %v1653_v19, %v1652_v9 }
 0x23f   : > { %2232 = vst [vmem:[%s3218_s10 + $0x10] sm:$0xff] %v2164_v22  }
 0x242   : > { %v2520_v58 = vpop.f32.mrf.mxu0 }
 0x243   : > { %v1562_v23 = vadd.f32 %v2520_v58, %v3211_v60 }
 0x244   : > { %v1553_v63 = vpop.f32.mrf.mxu0 }
 0x245   : > { %v1554_v2 = vadd.f32 %v3211_v60, %v1553_v63  ;;  %v1658_v29 = vmax.f32 %v1562_v23, 0.0 }
 0x246   : > { %v2521_v5 = vpop.f32.mrf.mxu0 }
 0x247   : > { %v1565_v26 = vadd.f32 %v2521_v5, %v3211_v60  ;;  %v1656_v32 = vmax.f32 %v1554_v2, 0.0 }
 0x248   : > { %v1556_v27 = vpop.f32.mrf.mxu0 }
 0x249   : > { %v1659_v30 = vmax.f32 %v1565_v26, 0.0  ;;  %v1557_v14 = vadd.f32 %v3211_v60, %v1556_v27 }
 0x24b   : > { %v2179_v21 = vpack.c.bf16 %v1659_v30, %v1658_v29  ;;  %v1657_v33 = vmax.f32 %v1557_v14, 0.0 }
 0x24d   : > { %2235 = vst [vmem:[%s3218_s10 + $0x28] sm:$0xff] %v2179_v21   ;;  %v2174_v7 = vpack.c.bf16 %v1657_v33, %v1656_v32 }
 0x24f   : > { %2234 = vst [vmem:[%s3218_s10 + $0x20] sm:$0xff] %v2174_v7  }
 0x252   : > { %v2524_v20 = vpop.f32.mrf.mxu0 }
 0x253   : > { %v1578_v25 = vadd.f32 %v2524_v20, %v3211_v60 }
 0x254   : > { %v1569_v34 = vpop.f32.mrf.mxu0 }
 0x255   : > { %v1570_v37 = vadd.f32 %v3211_v60, %v1569_v34  ;;  %v1662_v42 = vmax.f32 %v1578_v25, 0.0 }
 0x256   : > { %v2525_v12 = vpop.f32.mrf.mxu0 }
 0x257   : > { %v1581_v38 = vadd.f32 %v2525_v12, %v3211_v60  ;;  %v1660_v46 = vmax.f32 %v1570_v37, 0.0 }
 0x258   : > { %v1572_v41 = vpop.f32.mrf.mxu0 }
 0x259   : > { %v1663_v43 = vmax.f32 %v1581_v38, 0.0  ;;  %v1573_v45 = vadd.f32 %v3211_v60, %v1572_v41 }
 0x25b   : > { %v2189_v47 = vpack.c.bf16 %v1663_v43, %v1662_v42  ;;  %v1661_v28 = vmax.f32 %v1573_v45, 0.0 }
 0x25d   : > { %2237 = vst [vmem:[%s3218_s10 + $0x38] sm:$0xff] %v2189_v47   ;;  %v2184_v49 = vpack.c.bf16 %v1661_v28, %v1660_v46 }
 0x25f   : > { %2236 = vst [vmem:[%s3218_s10 + $0x30] sm:$0xff] %v2184_v49  }
 0x262   : > { %v2528_v16 = vpop.f32.mrf.mxu0 }
 0x263   : > { %v1594_v50 = vadd.f32 %v2528_v16, %v3211_v60 }
 0x264   : > { %v1585_v35 = vpop.f32.mrf.mxu0 }
 0x265   : > { %v1586_v36 = vadd.f32 %v3211_v60, %v1585_v35  ;;  %v1666_v51 = vmax.f32 %v1594_v50, 0.0 }
 0x266   : > { %v2529_v55 = vpop.f32.mrf.mxu0 }
 0x267   : > { %v1597_v40 = vadd.f32 %v2529_v55, %v3211_v60  ;;  %v1664_v53 = vmax.f32 %v1586_v36, 0.0 }
 0x268   : > { %v1588_v24 = vpop.f32.mrf.mxu0 }
 0x269   : > { %v1667_v1 = vmax.f32 %v1597_v40, 0.0  ;;  %v1589_v52 = vadd.f32 %v3211_v60, %v1588_v24 }
 0x26b   : > { %v2199_v57 = vpack.c.bf16 %v1667_v1, %v1666_v51  ;;  %v1665_v59 = vmax.f32 %v1589_v52, 0.0 }
 0x26d   : > { %2239 = vst [vmem:[%s3218_s10 + $0x48] sm:$0xff] %v2199_v57   ;;  %v2194_v6 = vpack.c.bf16 %v1665_v59, %v1664_v53 }
 0x26f   : > { %2238 = vst [vmem:[%s3218_s10 + $0x40] sm:$0xff] %v2194_v6  }
 0x272   : > { %v2532_v61 = vpop.f32.mrf.mxu0 }
 0x273   : > { %v1610_v62 = vadd.f32 %v2532_v61, %v3211_v60 }
 0x274   : > { %v1601_v11 = vpop.f32.mrf.mxu0 }
 0x275   : > { %v1602_v31 = vadd.f32 %v3211_v60, %v1601_v11  ;;  %v1670_v39 = vmax.f32 %v1610_v62, 0.0 }
 0x276   : > { %v2533_v0 = vpop.f32.mrf.mxu0 }
 0x277   : > { %v1613_v56 = vadd.f32 %v2533_v0, %v3211_v60  ;;  %v1668_v48 = vmax.f32 %v1602_v31, 0.0 }
 0x278   : > { %v1604_v3 = vpop.f32.mrf.mxu0 }
 0x279   : > { %v1671_v44 = vmax.f32 %v1613_v56, 0.0  ;;  %v1605_v8 = vadd.f32 %v3211_v60, %v1604_v3 }
 0x27b   : > { %v2209_v54 = vpack.c.bf16 %v1671_v44, %v1670_v39  ;;  %v1669_v10 = vmax.f32 %v1605_v8, 0.0 }
 0x27d   : > { %2241 = vst [vmem:[%s3218_s10 + $0x58] sm:$0xff] %v2209_v54   ;;  %v2204_v13 = vpack.c.bf16 %v1669_v10, %v1668_v48 }
 0x27f   : > { %2240 = vst [vmem:[%s3218_s10 + $0x50] sm:$0xff] %v2204_v13  }
 0x282   : > { %v2536_v15 = vpop.f32.mrf.mxu0 }
 0x283   : > { %v1626_v17 = vadd.f32 %v2536_v15, %v3211_v60 }
 0x284   : > { %v1617_v4 = vpop.f32.mrf.mxu0 }
 0x285   : > { %v1618_v18 = vadd.f32 %v3211_v60, %v1617_v4  ;;  %v1674_v58 = vmax.f32 %v1626_v17, 0.0 }
 0x286   : > { %v2537_v9 = vpop.f32.mrf.mxu0 }
 0x287   : > { %v1629_v19 = vadd.f32 %v2537_v9, %v3211_v60  ;;  %v1672_v5 = vmax.f32 %v1618_v18, 0.0 }
 0x288   : > { %v1620_v22 = vpop.f32.mrf.mxu0 }
 0x289   : > { %v1675_v63 = vmax.f32 %v1629_v19, 0.0  ;;  %v1621_v23 = vadd.f32 %v3211_v60, %v1620_v22 }
 0x28b   : > { %v2219_v2 = vpack.c.bf16 %v1675_v63, %v1674_v58  ;;  %v1673_v26 = vmax.f32 %v1621_v23, 0.0 }
 0x28d   : > { %2243 = vst [vmem:[%s3218_s10 + $0x68] sm:$0xff] %v2219_v2   ;;  %v2214_v27 = vpack.c.bf16 %v1673_v26, %v1672_v5 }
 0x28f   : > { %2242 = vst [vmem:[%s3218_s10 + $0x60] sm:$0xff] %v2214_v27  }
 0x292   : > { %v2540_v29 = vpop.f32.mrf.mxu0 }
 0x293   : > { %v1642_v14 = vadd.f32 %v2540_v29, %v3211_v60 }
 0x294   : > { %v1633_v30 = vpop.f32.mrf.mxu0 }
 0x295   : > { %v1634_v21 = vadd.f32 %v3211_v60, %v1633_v30  ;;  %v1678_v20 = vmax.f32 %v1642_v14, 0.0 }
 0x296   : > { %v2541_v32 = vpop.f32.mrf.mxu0 }
 0x297   : > { %v1645_v33 = vadd.f32 %v2541_v32, %v3211_v60  ;;  %v1676_v12 = vmax.f32 %v1634_v21, 0.0 }
 0x298   : > { %v1636_v7 = vpop.f32.mrf.mxu0 }
 0x299   : > { %v1679_v34 = vmax.f32 %v1645_v33, 0.0  ;;  %v1637_v25 = vadd.f32 %v3211_v60, %v1636_v7 }
 0x29b   : > { %v2229_v37 = vpack.c.bf16 %v1679_v34, %v1678_v20  ;;  %v1677_v38 = vmax.f32 %v1637_v25, 0.0 }
 0x29d   : > { %2245 = vst [vmem:[%s3218_s10 + $0x78] sm:$0xff] %v2229_v37   ;;  %v2224_v41 = vpack.c.bf16 %v1677_v38, %v1676_v12 }
 0x29f   : > { %2244 = vst [vmem:[%s3218_s10 + $0x70] sm:$0xff] %v2224_v41  }
 0x2a0   : > { %2876 = shalt.err (!%p2873_p5)
}
 0x2a1   : > { %s2877_s11 = scalar_lea.hbm %s3267_s29, 2048  ;;  %s2881_s25 = scalar_lea.hbm %s3323_s4, 4096 }
 0x2a2   : > { %p2878_p10 = scmp.ne.s32.totalorder %s3267_s29, %s2877_s11  ;;  %p2882_p6 = scmp.lt.s32.totalorder %s3267_s29, %s3323_s4 }
 0x2a3   : > { %p2883_p12 = scmp.lt.s32.totalorder %s2881_s25, %s2877_s11 }
 0x2a4   : > { %p2879_p1 = pnand %p2878_p10, %p3079_p7 }
 0x2a5   : > { %p2884_p3 = por %p2883_p12, %p2882_p6 }
 0x2a6   : > { %p2880_p4 = pneg %p2879_p1 }
 0x2a8   : > { %p2885_p8 = pnand %p2884_p3, %p2880_p4 }
 0x2aa   : > { %2888 = shalt.err (!%p2885_p8)
}
 0x2ab   : > { %s2957_s12 = smov 64   ;;  %s2958_s13 = smov 4  }
 0x2ac   : > { %2568 = dma.vmem_to_hbm [thread:$0]  (%p3079_p7), %s3269_s24, 2048, %s3267_s29, %s1841_s6, %s2957_s12, %s2957_s12, %s2958_s13  }
 0x2ad PF: > { %s1869_s22 = sand.u32 1, %s2927_s15   ;;  %p3337_p9 = scmp.ne.s32.totalorder %s3330_s26, 0 }
 0x2ae   : > { %p3338_p11 = scmp.ge.s32.totalorder %s2947_s20, 2  ;;  %s1870_s5 = scalar_lea.sflag [#allocation5], %s1869_s22 }
 0x2b0   : > { %p2582_p2 = pnand %p3338_p11, %p3337_p9 }
 0x2b2   : > { %p2583_p13 = pneg %p2582_p2 }
 0x2b4   : > { %2922 = dma.done.wait (%p2583_p13), %s1870_s5, 2048  }
 0x2b5   : > { %2924 = vsyncadd (%p2583_p13), %s1870_s5, 4294965248  ;;  %s21_s20 = sadd.s32 1, %s2947_s20   ;;  %s3339_s15 = smov %s2931_s16 }
 0x2b6   : > { %p18_p0 = scmp.ge.s32.totalorder %s21_s20, 4   ;;  %s3340_s16 = smov %s2935_s17 }
 0x2b7   : > { %s3341_s17 = smov %s3088_s7  ;;  %s3342_s18 = smov %s2943_s19 }
 0x2b8   : > { %s3343_s19 = smov %s3345_s21  ;;  %20 = sbr.rel (!%p18_p0) target bundleno = 7 (0x7), region = 98 }
 0x2bd   :  { %1875 = vsyncpa [#allocation4], 1 }
 0x2be   :  { %1877 = vsyncpa [#allocation4 + $0x1], 1 }
 0x2bf   :  { %1878 = vsyncpa [#allocation7], 1 }
 0x2c0   :  { %1879 = vsyncpa [#allocation5], 1 }
 0x2c1   :  { %1881 = vsyncpa [#allocation5 + $0x1], 1 }

</bundles_post_ra>
